<compile_context>
chip_gen: v7x
topology: tpu7x:2x2x1
jax: 0.10.0
libtpu: 0.0.40
codegen_flags: <defaults>
</compile_context>

<pallas_src>
import jax
import jax.numpy as jnp
from jax.experimental import pallas as pl
from jax.experimental.pallas import tpu as pltpu


def _round_up(x, m):
    return (x + m - 1) // m * m


def _fcn_kernel(idx_ref, emb_ref,
                w0d_ref, w0p_ref, b0_ref,
                w1_ref, b1_ref,
                w2_ref, b2_ref,
                o_ref):
    """Fused embedding-bag pooling + 3-layer MLP for one batch tile.

    idx_ref : [1, 2*tb, V*C] int32, rows [0:tb] = diagnoses, [tb:2tb] = procedures
    emb_ref : [vocab, E] bf16 embedding table (VMEM-resident, grid-invariant)
    w0d/w0p : [E, H0] f32 first Linear split over the concat axis, pre-scaled 1/C
    b0,w1,b1: remaining MLP params (f32)
    w2,b2   : [H1, n_pad], [1, n_pad] f32, class dim padded to a lane multiple
    o_ref   : [tb, n_pad] f32
    """
    _, two_tb, _ = idx_ref.shape
    tb = two_tb // 2
    vocab = emb_ref.shape[0]

    idx = idx_ref[0]                                            # [2*tb, V*C]

    # Embedding-bag as a count-matrix matmul on the MXU:
    #   sum over the V*C gathered rows == counts[2tb, vocab] @ emb[vocab, E].
    # Vectorized one-hot: one 3-D compare + sublane reduce (XLU), no unroll.
    # Counts accumulate in f32 (exact; v5e VPU has no bf16), cast to bf16 once
    # so the pooling matmul runs at the native bf16 MXU rate.
    iota_vocab = jax.lax.broadcasted_iota(jnp.int32, (1, 1, vocab), 2)
    onehot = (idx[:, :, None] == iota_vocab).astype(jnp.float32)  # [2tb, vc, vocab]
    counts = jnp.sum(onehot, axis=1).astype(jnp.bfloat16)         # [2tb, vocab]

    pooled = jnp.dot(counts, emb_ref[...],
                     preferred_element_type=jnp.float32)          # [2tb, E] f32
    d_pool = pooled[:tb]
    p_pool = pooled[tb:]

    # cat([d, p], -1) @ W0 == d @ W0[:E] + p @ W0[E:]  (1/C already folded in)
    h = (jnp.dot(d_pool, w0d_ref[...], preferred_element_type=jnp.float32)
         + jnp.dot(p_pool, w0p_ref[...], preferred_element_type=jnp.float32)
         + b0_ref[...])                                  # fc_layers[0]
    h = jnp.maximum(h, 0.0)                              # relu before fc_layers[1]
    h = jnp.dot(h, w1_ref[...], preferred_element_type=jnp.float32) + b1_ref[...]
    h = jnp.maximum(h, 0.0)                              # relu before fc_layers[2]
    out = jnp.dot(h, w2_ref[...], preferred_element_type=jnp.float32) + b2_ref[...]
    o_ref[...] = out.astype(o_ref.dtype)                 # lane-dense (n_pad) store


def fcn_classifier_forward(diag_idx, proc_idx, params, *, batch_tile=256):
    """JAX wrapper: pack indices, fold constants, call the Pallas kernel."""
    emb = params["embedding"]
    B, V, C = diag_idx.shape
    vocab, E = emb.shape

    # Batch tile: >=2 grid steps when B > 8 (v7x megacore), sublane-aligned,
    # capped at batch_tile (256 is MXU-row friendly on v6e/v7x).
    tb = max(8, min(batch_tile, _round_up(-(-B // 2), 8)))
    b_pad = _round_up(B, tb)
    n_tiles = b_pad // tb

    # --- indices: flatten, pad batch, stack diag/proc along the sublane axis
    vc = V * C
    d_idx = diag_idx.reshape(B, vc).astype(jnp.int32)
    p_idx = proc_idx.reshape(B, vc).astype(jnp.int32)
    if b_pad != B:
        pad = ((0, b_pad - B), (0, 0))
        d_idx = jnp.pad(d_idx, pad)   # pad rows pool emb[0]; sliced off below
        p_idx = jnp.pad(p_idx, pad)
    idx = jnp.concatenate([d_idx.reshape(n_tiles, tb, vc),
                           p_idx.reshape(n_tiles, tb, vc)], axis=1)  # [nt, 2tb, vc]

    # --- parameters: bf16 table; split W0 with 1/C folded; pad class dim to 128
    emb_bf16 = emb.astype(jnp.bfloat16)
    inv_c = jnp.float32(1.0 / C)
    w0d = (params["w0"][:E] * inv_c).astype(jnp.float32)    # [E, H0]
    w0p = (params["w0"][E:] * inv_c).astype(jnp.float32)    # [E, H0]
    b0 = params["b0"].reshape(1, -1).astype(jnp.float32)
    w1 = params["w1"].astype(jnp.float32)
    b1 = params["b1"].reshape(1, -1).astype(jnp.float32)
    n_class = params["w2"].shape[1]
    n_pad = _round_up(n_class, 128)
    w2 = jnp.pad(params["w2"].astype(jnp.float32), ((0, 0), (0, n_pad - n_class)))
    b2 = jnp.pad(params["b2"].astype(jnp.float32),
                 (0, n_pad - n_class)).reshape(1, -1)
    H0, H1 = w0d.shape[1], w1.shape[1]

    idx_spec = pl.BlockSpec((1, 2 * tb, vc), lambda i: (i, 0, 0))

    def const_spec(shape):
        return pl.BlockSpec(shape, lambda i: (0,) * len(shape))

    # --- VMEM budget (resident table/weights possibly double-buffered,
    #     double-buffered idx/out tiles, one-hot temporary) + headroom.
    resident = (emb_bf16.size * 2
                + 4 * (w0d.size + w0p.size + b0.size + w1.size + b1.size
                       + w2.size + b2.size))
    tile_bytes = 2 * (2 * tb * vc * 4) + 2 * (tb * n_pad * 4)
    onehot_bytes = 2 * tb * _round_up(vc, 8) * _round_up(vocab, 128) * 4
    vmem_bytes = 2 * resident + tile_bytes + onehot_bytes + (4 << 20)
    vmem_bytes = int(min(max(vmem_bytes, 16 << 20), 64 << 20))

    flops = (2 * (2 * b_pad) * vocab * E
             + 2 * b_pad * (2 * E * H0 + H0 * H1 + H1 * n_pad))
    bytes_accessed = (2 * b_pad * vc * 4                   # indices
                      + vocab * E * 2                      # bf16 table (resident)
                      + 4 * (2 * E * H0 + H0 + H0 * H1 + H1 + H1 * n_pad + n_pad)
                      + b_pad * n_pad * 4)                 # output

    out = pl.pallas_call(
        _fcn_kernel,
        out_shape=jax.ShapeDtypeStruct((b_pad, n_pad), jnp.float32),
        grid=(n_tiles,),
        in_specs=[idx_spec,
                  const_spec(emb_bf16.shape),
                  const_spec(w0d.shape), const_spec(w0p.shape), const_spec(b0.shape),
                  const_spec(w1.shape), const_spec(b1.shape),
                  const_spec(w2.shape), const_spec(b2.shape)],
        out_specs=pl.BlockSpec((tb, n_pad), lambda i: (i, 0)),
        compiler_params=pltpu.CompilerParams(
            dimension_semantics=("parallel",),
            vmem_limit_bytes=vmem_bytes),
        cost_estimate=pl.CostEstimate(flops=int(flops), transcendentals=0,
                                      bytes_accessed=int(bytes_accessed)),
    )(idx, emb_bf16, w0d, w0p, b0, w1, b1, w2, b2)
    return out[:B, :n_class]


def fcn_classifier_reference(diag_idx, proc_idx, params):
    """Pure-JAX reference mirroring the PyTorch forward exactly (f32 table)."""
    emb = params["embedding"]
    d = emb[diag_idx]                                 # [B, V, C, E]
    p = emb[proc_idx]
    d = jnp.sum(jnp.mean(d, axis=2), axis=1)          # mean over codes, sum visits
    p = jnp.sum(jnp.mean(p, axis=2), axis=1)
    x = jnp.concatenate([d, p], axis=-1)              # [B, 2E]
    h = x @ params["w0"] + params["b0"]               # fc_layers[0]
    h = jax.nn.relu(h) @ params["w1"] + params["b1"]
    out = jax.nn.relu(h) @ params["w2"] + params["b2"]
    return out


if __name__ == "__main__":
    # Small, deterministic config (hidden_dims=[32, 32] -> 3 Linear layers).
    B, V, C = 2, 3, 4          # batch, visits per sample, codes per visit
    VOCAB, E = 64, 32          # embedding table
    H0, H1 = 32, 32            # hidden dims
    N_CLASS = 8

    key = jax.random.PRNGKey(0)
    k_emb, k_di, k_pi, k0, k1, k2, kb0, kb1, kb2 = jax.random.split(key, 9)

    params = {
        "embedding": jax.random.normal(k_emb, (VOCAB, E), jnp.float32),
        # Linear weights stored as [in, out] (== PyTorch weight.T), so the
        # forward is x @ W + b, matching nn.Linear semantics.
        "w0": jax.random.normal(k0, (2 * E, H0), jnp.float32) * 0.1,
        "b0": jax.random.normal(kb0, (H0,), jnp.float32) * 0.1,
        "w1": jax.random.normal(k1, (H0, H1), jnp.float32) * 0.1,
        "b1": jax.random.normal(kb1, (H1,), jnp.float32) * 0.1,
        "w2": jax.random.normal(k2, (H1, N_CLASS), jnp.float32) * 0.1,
        "b2": jax.random.normal(kb2, (N_CLASS,), jnp.float32) * 0.1,
    }

    diag_idx = jax.random.randint(k_di, (B, V, C), 0, VOCAB, dtype=jnp.int32)
    proc_idx = jax.random.randint(k_pi, (B, V, C), 0, VOCAB, dtype=jnp.int32)

    out = jax.block_until_ready(fcn_classifier_forward(diag_idx, proc_idx, params))
    ref = jax.block_until_ready(fcn_classifier_reference(diag_idx, proc_idx, params))

    assert out.shape == (B, N_CLASS), out.shape
    # Tolerance widened vs. the f32 version: the embedding table is held in
    # bf16 for the MXU pooling matmul (counts themselves are exact), while the
    # reference gathers/sums in exact f32.
    assert jnp.allclose(out, ref, atol=3e-2, rtol=3e-2), (out, ref)
    print("KERNEL_OK")
</pallas_src>

<mosaic_0001>
module attributes {stable_mosaic.version = 11 : i64} {
  func.func @_fcn_kernel(%arg0: i32, %arg1: memref<1x16x12xi32, #tpu.memory_space<vmem>>, %arg2: memref<64x32xbf16, #tpu.memory_space<vmem>>, %arg3: memref<32x32xf32, #tpu.memory_space<vmem>>, %arg4: memref<32x32xf32, #tpu.memory_space<vmem>>, %arg5: memref<1x32xf32, #tpu.memory_space<vmem>>, %arg6: memref<32x32xf32, #tpu.memory_space<vmem>>, %arg7: memref<1x32xf32, #tpu.memory_space<vmem>>, %arg8: memref<32x128xf32, #tpu.memory_space<vmem>>, %arg9: memref<1x128xf32, #tpu.memory_space<vmem>>, %arg10: memref<8x128xf32, #tpu.memory_space<vmem>>) attributes {dimension_semantics = [#tpu.dimension_semantics<parallel>], iteration_bounds = array<i64: 1>, scalar_prefetch = 0 : i64, scratch_operands = 0 : i64, tpu.core_type = #tpu.core_type<tc>, window_params = [{transform_indices = @transform_0, window_bounds = array<i64: 1, 16, 12>}, {pipeline_mode = #tpu.pipeline_mode<synchronous>, transform_indices = @transform_1, window_bounds = array<i64: 64, 32>}, {pipeline_mode = #tpu.pipeline_mode<synchronous>, transform_indices = @transform_2, window_bounds = array<i64: 32, 32>}, {pipeline_mode = #tpu.pipeline_mode<synchronous>, transform_indices = @transform_3, window_bounds = array<i64: 32, 32>}, {pipeline_mode = #tpu.pipeline_mode<synchronous>, transform_indices = @transform_4, window_bounds = array<i64: 1, 32>}, {pipeline_mode = #tpu.pipeline_mode<synchronous>, transform_indices = @transform_5, window_bounds = array<i64: 32, 32>}, {pipeline_mode = #tpu.pipeline_mode<synchronous>, transform_indices = @transform_6, window_bounds = array<i64: 1, 32>}, {pipeline_mode = #tpu.pipeline_mode<synchronous>, transform_indices = @transform_7, window_bounds = array<i64: 32, 128>}, {pipeline_mode = #tpu.pipeline_mode<synchronous>, transform_indices = @transform_8, window_bounds = array<i64: 1, 128>}, {transform_indices = @transform_9, window_bounds = array<i64: 8, 128>}]} {
    %c0 = arith.constant 0 : index
    %c0_0 = arith.constant 0 : index
    %c0_1 = arith.constant 0 : index
    %0 = vector.load %arg1[%c0, %c0_0, %c0_1] : memref<1x16x12xi32, #tpu.memory_space<vmem>>, vector<1x16x12xi32>
    %1 = vector.shape_cast %0 : vector<1x16x12xi32> to vector<16x12xi32>
    %2 = tpu.iota {dimensions = array<i32: 2>} : vector<1x1x64xi32>
    %3 = vector.shape_cast %1 : vector<16x12xi32> to vector<16x12x1xi32>
    %4 = vector.broadcast %3 : vector<16x12x1xi32> to vector<16x12x64xi32>
    %5 = vector.broadcast %2 : vector<1x1x64xi32> to vector<16x12x64xi32>
    %6 = arith.cmpi eq, %4, %5 : vector<16x12x64xi32>
    %7 = arith.extui %6 : vector<16x12x64xi1> to vector<16x12x64xi32>
    %8 = arith.sitofp %7 : vector<16x12x64xi32> to vector<16x12x64xf32>
    %cst = arith.constant dense<0.000000e+00> : vector<16x64xf32>
    %9 = vector.multi_reduction <add>, %8, %cst [1] : vector<16x12x64xf32> to vector<16x64xf32>
    %10 = arith.truncf %9 : vector<16x64xf32> to vector<16x64xbf16>
    %c0_2 = arith.constant 0 : index
    %c0_3 = arith.constant 0 : index
    %11 = vector.load %arg2[%c0_2, %c0_3] : memref<64x32xbf16, #tpu.memory_space<vmem>>, vector<64x32xbf16>
    %cst_4 = arith.constant dense<0.000000e+00> : vector<16x32xf32>
    %12 = tpu.matmul %10, %11, %cst_4 {dimension_numbers = #tpu.dot_dimension_numbers<[1], [0], [0], [1], [0, 0, 1, 1], [], []>} : vector<16x64xbf16>, vector<64x32xbf16>, vector<16x32xf32> -> vector<16x32xf32>
    %13 = vector.extract_strided_slice %12 {offsets = [0, 0], sizes = [8, 32], strides = [1, 1]} : vector<16x32xf32> to vector<8x32xf32>
    %14 = vector.extract_strided_slice %12 {offsets = [8, 0], sizes = [8, 32], strides = [1, 1]} : vector<16x32xf32> to vector<8x32xf32>
    %c0_5 = arith.constant 0 : index
    %c0_6 = arith.constant 0 : index
    %15 = vector.load %arg3[%c0_5, %c0_6] : memref<32x32xf32, #tpu.memory_space<vmem>>, vector<32x32xf32>
    %cst_7 = arith.constant dense<0.000000e+00> : vector<8x32xf32>
    %16 = tpu.matmul %13, %15, %cst_7 {dimension_numbers = #tpu.dot_dimension_numbers<[1], [0], [0], [1], [0, 0, 1, 1], [], []>} : vector<8x32xf32>, vector<32x32xf32>, vector<8x32xf32> -> vector<8x32xf32>
    %c0_8 = arith.constant 0 : index
    %c0_9 = arith.constant 0 : index
    %17 = vector.load %arg4[%c0_8, %c0_9] : memref<32x32xf32, #tpu.memory_space<vmem>>, vector<32x32xf32>
    %cst_10 = arith.constant dense<0.000000e+00> : vector<8x32xf32>
    %18 = tpu.matmul %14, %17, %cst_10 {dimension_numbers = #tpu.dot_dimension_numbers<[1], [0], [0], [1], [0, 0, 1, 1], [], []>} : vector<8x32xf32>, vector<32x32xf32>, vector<8x32xf32> -> vector<8x32xf32>
    %19 = arith.addf %16, %18 : vector<8x32xf32>
    %c0_11 = arith.constant 0 : index
    %c0_12 = arith.constant 0 : index
    %20 = vector.load %arg5[%c0_11, %c0_12] : memref<1x32xf32, #tpu.memory_space<vmem>>, vector<1x32xf32>
    %21 = vector.broadcast %20 : vector<1x32xf32> to vector<8x32xf32>
    %22 = arith.addf %19, %21 : vector<8x32xf32>
    %cst_13 = arith.constant 0.000000e+00 : f32
    %23 = vector.broadcast %cst_13 : f32 to vector<8x32xf32>
    %24 = arith.maximumf %22, %23 : vector<8x32xf32>
    %c0_14 = arith.constant 0 : index
    %c0_15 = arith.constant 0 : index
    %25 = vector.load %arg6[%c0_14, %c0_15] : memref<32x32xf32, #tpu.memory_space<vmem>>, vector<32x32xf32>
    %cst_16 = arith.constant dense<0.000000e+00> : vector<8x32xf32>
    %26 = tpu.matmul %24, %25, %cst_16 {dimension_numbers = #tpu.dot_dimension_numbers<[1], [0], [0], [1], [0, 0, 1, 1], [], []>} : vector<8x32xf32>, vector<32x32xf32>, vector<8x32xf32> -> vector<8x32xf32>
    %c0_17 = arith.constant 0 : index
    %c0_18 = arith.constant 0 : index
    %27 = vector.load %arg7[%c0_17, %c0_18] : memref<1x32xf32, #tpu.memory_space<vmem>>, vector<1x32xf32>
    %28 = vector.broadcast %27 : vector<1x32xf32> to vector<8x32xf32>
    %29 = arith.addf %26, %28 : vector<8x32xf32>
    %cst_19 = arith.constant 0.000000e+00 : f32
    %30 = vector.broadcast %cst_19 : f32 to vector<8x32xf32>
    %31 = arith.maximumf %29, %30 : vector<8x32xf32>
    %c0_20 = arith.constant 0 : index
    %c0_21 = arith.constant 0 : index
    %32 = vector.load %arg8[%c0_20, %c0_21] : memref<32x128xf32, #tpu.memory_space<vmem>>, vector<32x128xf32>
    %cst_22 = arith.constant dense<0.000000e+00> : vector<8x128xf32>
    %33 = tpu.matmul %31, %32, %cst_22 {dimension_numbers = #tpu.dot_dimension_numbers<[1], [0], [0], [1], [0, 0, 1, 1], [], []>} : vector<8x32xf32>, vector<32x128xf32>, vector<8x128xf32> -> vector<8x128xf32>
    %c0_23 = arith.constant 0 : index
    %c0_24 = arith.constant 0 : index
    %34 = vector.load %arg9[%c0_23, %c0_24] : memref<1x128xf32, #tpu.memory_space<vmem>>, vector<1x128xf32>
    %35 = vector.broadcast %34 : vector<1x128xf32> to vector<8x128xf32>
    %36 = arith.addf %33, %35 : vector<8x128xf32>
    %c0_25 = arith.constant 0 : index
    %c0_26 = arith.constant 0 : index
    %37 = vector.load %arg10[%c0_25, %c0_26] : memref<8x128xf32, #tpu.memory_space<vmem>>, vector<8x128xf32>
    tpu.vector_store %arg10[%c0_25, %c0_26], %36 {strides = array<i32>} : memref<8x128xf32, #tpu.memory_space<vmem>>, vector<8x128xf32>,
    return
  }
  func.func @transform_0(%arg0: i32) -> (i32, i32, i32) {
    %c0_i32 = arith.constant 0 : i32
    %c0_i32_0 = arith.constant 0 : i32
    %c0_i32_1 = arith.constant 0 : i32
    return %arg0, %c0_i32, %c0_i32_0 : i32, i32, i32
  }
  func.func @transform_1(%arg0: i32) -> (i32, i32) {
    %c0_i32 = arith.constant 0 : i32
    %c0_i32_0 = arith.constant 0 : i32
    %c0_i32_1 = arith.constant 0 : i32
    return %c0_i32, %c0_i32_0 : i32, i32
  }
  func.func @transform_2(%arg0: i32) -> (i32, i32) {
    %c0_i32 = arith.constant 0 : i32
    %c0_i32_0 = arith.constant 0 : i32
    %c0_i32_1 = arith.constant 0 : i32
    return %c0_i32, %c0_i32_0 : i32, i32
  }
  func.func @transform_3(%arg0: i32) -> (i32, i32) {
    %c0_i32 = arith.constant 0 : i32
    %c0_i32_0 = arith.constant 0 : i32
    %c0_i32_1 = arith.constant 0 : i32
    return %c0_i32, %c0_i32_0 : i32, i32
  }
  func.func @transform_4(%arg0: i32) -> (i32, i32) {
    %c0_i32 = arith.constant 0 : i32
    %c0_i32_0 = arith.constant 0 : i32
    %c0_i32_1 = arith.constant 0 : i32
    return %c0_i32, %c0_i32_0 : i32, i32
  }
  func.func @transform_5(%arg0: i32) -> (i32, i32) {
    %c0_i32 = arith.constant 0 : i32
    %c0_i32_0 = arith.constant 0 : i32
    %c0_i32_1 = arith.constant 0 : i32
    return %c0_i32, %c0_i32_0 : i32, i32
  }
  func.func @transform_6(%arg0: i32) -> (i32, i32) {
    %c0_i32 = arith.constant 0 : i32
    %c0_i32_0 = arith.constant 0 : i32
    %c0_i32_1 = arith.constant 0 : i32
    return %c0_i32, %c0_i32_0 : i32, i32
  }
  func.func @transform_7(%arg0: i32) -> (i32, i32) {
    %c0_i32 = arith.constant 0 : i32
    %c0_i32_0 = arith.constant 0 : i32
    %c0_i32_1 = arith.constant 0 : i32
    return %c0_i32, %c0_i32_0 : i32, i32
  }
  func.func @transform_8(%arg0: i32) -> (i32, i32) {
    %c0_i32 = arith.constant 0 : i32
    %c0_i32_0 = arith.constant 0 : i32
    %c0_i32_1 = arith.constant 0 : i32
    return %c0_i32, %c0_i32_0 : i32, i32
  }
  func.func @transform_9(%arg0: i32) -> (i32, i32) {
    %c0_i32 = arith.constant 0 : i32
    %c0_i32_0 = arith.constant 0 : i32
    return %arg0, %c0_i32 : i32, i32
  }
}

</mosaic_0001>

<bundles_post_ra>
// kernel: tpu_custom_call.1
= control target key start
LH: loop header
LB: loop body
LE: loop exit
PB: predicated region body
PF: predicated region fallthrough
CT: control target
= control target key end

     0   :  { %14 = vsyncpa [#allocation3], 0  ;;  %s1474_s0 = inlined_call_operand.vmem [shape: s32[1,16,12], index: 0, kind: input, shape index: {}]   ;;  %s1475_s1 = inlined_call_operand.vmem [shape: bf16[64,32], index: 1, kind: input, shape index: {}]   ;;  %s1476_s2 = inlined_call_operand.vmem [shape: f32[32,32], index: 2, kind: input, shape index: {}]   ;;  %s1477_s3 = inlined_call_operand.vmem [shape: f32[32,32], index: 3, kind: input, shape index: {}]   ;;  %s1478_s4 = inlined_call_operand.vmem [shape: f32[1,32], index: 4, kind: input, shape index: {}]   ;;  %s1479_s5 = inlined_call_operand.hbm [shape: f32[32,32], index: 5, kind: input, shape index: {}]   ;;  %s1480_s6 = inlined_call_operand.vmem [shape: f32[1,32], index: 6, kind: input, shape index: {}]   ;;  %s1481_s7 = inlined_call_operand.vmem [shape: f32[32,128], index: 7, kind: input, shape index: {}]   ;;  %s1482_s8 = inlined_call_operand.vmem [shape: f32[1,128], index: 8, kind: input, shape index: {}]   ;;  %s1483_s9 = inlined_call_operand.hbm [shape: f32[8,128], index: 9, kind: output, shape index: {}]  }
   0x1   :  { %15 = vsyncpa [#allocation4], 0  ;;  %s1173_s30 = smov [#allocation2]   ;;  %s1125_s13 = scalar_lea.hbm %s1479_s5, 512 }
   0x2   :  { %s31_s10 = sshll.u32 %s1173_s30, 4  ;;  %p1126_p0 = scmp.ne.s32.totalorder %s1479_s5, %s1125_s13  ;;  %s32_s10 = int_to_ptr.vmem [resolvable:$true] %s31_s10 }
   0x3   :  { %p1129_p1 = scmp.lt.u32.totalorder %s1125_s13, %s1479_s5 }
   0x5   :  { %p1131_p2 = pnand %p1129_p1, %p1126_p0 }
   0x7   :  { %1134 = shalt.err (!%p1131_p2)
}
   0x8   :  { %s1135_s18 = scalar_lea.vmem %s32_s10, 512  ;;  %p1140_p4 = scmp.lt.s32.totalorder %s32_s10, %s32_s10 }
   0x9   :  { %p1136_p3 = scmp.ne.s32.totalorder %s32_s10, %s1135_s18  ;;  %p1141_p5 = scmp.lt.s32.totalorder %s1135_s18, %s1135_s18 }
   0xb   :  { %p1142_p6 = por %p1141_p5, %p1140_p4 }
   0xd   :  { %p1143_p7 = pnand %p1142_p6, %p1136_p3 }
   0xf   :  { %1146 = shalt.err (!%p1143_p7)
}
  0x10   :  { %s1174_s19 = smov 128   ;;  %s1175_s20 = smov 8  }
  0x11   :  { %37 = dma.hbm_to_vmem [thread:$0]  %s1479_s5, 512, %s32_s10, [#allocation3], %s1174_s19, %s1174_s19, %s1175_s20  }
  0x12   :  { %1169 = dma.done.wait [#allocation3], 512  }
  0x13   :  { %1170 = vsyncadd [#allocation3], 4294966784  ;;  %v50_v0 = vlaneseq  ;;  %v1176_v1 = vmov 0.0   ;;  %v48_v5 = vld [vmem:[%s1474_s0] sm:$0xff]  ;;  %v49_v8 = vld [vmem:[%s1474_s0 + $0x8] sm:$0xff]  ;;  %vm1177_vm0 = vmmov 0  }
  0x14   :  { %1034 = vmatprep.subr.bf16.mxu0 %v1176_v1  ;;  %v1121_v29 = vld [vmem:[%s1475_s1] sm:$0xff]   ;;  %v1122_v30 = vld [vmem:[%s1475_s1 + $0x8] sm:$0xff]   ;;  %v1123_v31 = vld [vmem:[%s1475_s1 + $0x10] sm:$0xff]   ;;  %1042 = vmatprep.mubr.msk.bf16.mxu0 %vm1177_vm0, %v1176_v1  ;;  %v1178_v36 = vmov 0.0|0.0   ;;  %vm326_vm3 = vcmask 519168   ;;  %vm324_vm4 = vcmask 523264  }
  0x15   :  { %v53_v2 = vshrl.u32 %v50_v0, 7  ;;  %1035 = vmatpush3.bf16.msra.mxu0 %v1121_v29  ;;  %v1124_v32 = vld [vmem:[%s1475_s1 + $0x18] sm:$0xff]   ;;  %1054 = vmatprep.mubr.msk.f32.mxu1 %vm1177_vm0, %v1176_v1  ;;  %v620_v33 = vld [vmem:[%s1477_s3] sm:$0xff]  ;;  %v621_v34 = vld [vmem:[%s1477_s3 + $0x8] sm:$0xff]  ;;  %v1286_v40 = vand.u32 127, %v50_v0  ;;  %s1179_s15 = smov [#allocation5]  }
  0x16   :  { %1036 = vmatprep.subr.bf16.mxu0 %v1176_v1  ;;  %v622_v35 = vld [vmem:[%s1477_s3 + $0x10] sm:$0xff]  ;;  %1090 = vmatprep.subr.bf16.mxu1 %v1178_v36  ;;  %v1091_v37 = vpack.c.bf16 %v621_v34, %v620_v33  ;;  %v623_v38 = vld [vmem:[%s1477_s3 + $0x18] sm:$0xff]  ;;  %s956_s16 = sshll.u32 %s1179_s15, 4  ;;  %s957_s16 = int_to_ptr.vmem [resolvable:$true] %s956_s16 }
  0x17   :  { %v65_v3 = vsub.s32 1, %v53_v2  ;;  %v54_v4 = vsub.s32 0, %v53_v2  ;;  %v76_v11 = vsub.s32 2, %v53_v2  ;;  %v87_v14 = vsub.s32 3, %v53_v2  ;;  %p1152_p9 = scmp.lt.s32.totalorder %s957_s16, %s957_s16 }
  0x18   :  { %v98_v17 = vsub.s32 4, %v53_v2  ;;  %v109_v20 = vsub.s32 5, %v53_v2  ;;  %v120_v23 = vsub.s32 6, %v53_v2  ;;  %v131_v26 = vsub.s32 7, %v53_v2  ;;  %1092 = vmatpush3.bf16.msra.mxu1 %v1091_v37 }
  0x19   :  { %v66_v6 = vrot.slane %v48_v5, %v65_v3  ;;  %v55_v7 = vrot.slane %v48_v5, %v54_v4  ;;  %v143_v9 = vrot.slane %v49_v8, %v54_v4  ;;  %v154_v10 = vrot.slane %v49_v8, %v65_v3  ;;  %1037 = vmatpush3.bf16.msra.mxu0 %v1122_v30 }
  0x1a   :  { %v77_v12 = vrot.slane %v48_v5, %v76_v11  ;;  %v165_v13 = vrot.slane %v49_v8, %v76_v11  ;;  %v88_v15 = vrot.slane %v48_v5, %v87_v14  ;;  %v176_v16 = vrot.slane %v49_v8, %v87_v14  ;;  %1038 = vmatprep.subr.bf16.mxu0 %v1176_v1 }
  0x1b   :  { %68 = vbcast.lane.b32.xlu1 %v66_v6, 256  ;;  %57 = vbcast.lane.b32.xlu0 %v55_v7, 256  ;;  %v99_v18 = vrot.slane %v48_v5, %v98_v17  ;;  %v187_v19 = vrot.slane %v49_v8, %v98_v17  ;;  %v110_v21 = vrot.slane %v48_v5, %v109_v20 }
  0x1c   :  { %v198_v22 = vrot.slane %v49_v8, %v109_v20  ;;  %v121_v24 = vrot.slane %v48_v5, %v120_v23  ;;  %v209_v25 = vrot.slane %v49_v8, %v120_v23  ;;  %v132_v27 = vrot.slane %v48_v5, %v131_v26  ;;  %1093 = vmatprep.subr.bf16.mxu1 %v1178_v36 }
  0x1d   :  { %v220_v28 = vrot.slane %v49_v8, %v131_v26  ;;  %1039 = vmatpush3.bf16.msra.mxu0 %v1123_v31  ;;  %v1094_v39 = vpack.c.bf16 %v623_v38, %v622_v35 }
  0x1e   :  { %1040 = vmatprep.subr.bf16.mxu0 %v1176_v1 }
  0x1f   :  { %72 = vbcast.lane.b32.xlu1 %v66_v6, 264  ;;  %61 = vbcast.lane.b32.xlu0 %v55_v7, 264 }
  0x20   :  { %1095 = vmatpush3.bf16.msra.mxu1 %v1094_v39 }
  0x21   :  { %1041 = vmatpush3.bf16.msra.mxu0 %v1124_v32  ;;  %1096 = vmatprep.subr.bf16.mxu1 %v1178_v36 }
  0x22   :  { %1102 = vmatprep.subr.bf16.mxu0 %v1178_v36 }
  0x23   :  { %149 = vbcast.lane.b32.xlu1 %v143_v9, 264  ;;  %145 = vbcast.lane.b32.xlu0 %v143_v9, 256 }
  0x27   :  { %160 = vbcast.lane.b32.xlu1 %v154_v10, 264  ;;  %156 = vbcast.lane.b32.xlu0 %v154_v10, 256 }
  0x2b   :  { %83 = vbcast.lane.b32.xlu1 %v77_v12, 264  ;;  %79 = vbcast.lane.b32.xlu0 %v77_v12, 256 }
  0x2f   :  { %171 = vbcast.lane.b32.xlu1 %v165_v13, 264  ;;  %167 = vbcast.lane.b32.xlu0 %v165_v13, 256 }
  0x33   :  { %94 = vbcast.lane.b32.xlu1 %v88_v15, 264  ;;  %90 = vbcast.lane.b32.xlu0 %v88_v15, 256 }
  0x37   :  { %182 = vbcast.lane.b32.xlu1 %v176_v16, 264  ;;  %178 = vbcast.lane.b32.xlu0 %v176_v16, 256 }
  0x3b   :  { %105 = vbcast.lane.b32.xlu1 %v99_v18, 264  ;;  %101 = vbcast.lane.b32.xlu0 %v99_v18, 256 }
  0x3f   :  { %193 = vbcast.lane.b32.xlu1 %v187_v19, 264  ;;  %189 = vbcast.lane.b32.xlu0 %v187_v19, 256 }
  0x43   :  { %116 = vbcast.lane.b32.xlu1 %v110_v21, 264  ;;  %112 = vbcast.lane.b32.xlu0 %v110_v21, 256 }
  0x47   :  { %204 = vbcast.lane.b32.xlu1 %v198_v22, 264  ;;  %200 = vbcast.lane.b32.xlu0 %v198_v22, 256 }
  0x4b   :  { %127 = vbcast.lane.b32.xlu1 %v121_v24, 264  ;;  %123 = vbcast.lane.b32.xlu0 %v121_v24, 256 }
  0x4f   :  { %215 = vbcast.lane.b32.xlu1 %v209_v25, 264  ;;  %211 = vbcast.lane.b32.xlu0 %v209_v25, 256 }
  0x53   :  { %138 = vbcast.lane.b32.xlu1 %v132_v27, 264  ;;  %134 = vbcast.lane.b32.xlu0 %v132_v27, 256 }
  0x57   :  { %226 = vbcast.lane.b32.xlu1 %v220_v28, 264  ;;  %222 = vbcast.lane.b32.xlu0 %v220_v28, 256 }
  0x8d   :  { %v69_v41 = vpop.permute.xlu1 %68  ;;  %v58_v42 = vpop.permute.xlu0 %57 }
  0x8e   :  { %vm230_vm1 = vcmp.eq.s32.totalorder %v69_v41, %v1286_v40  ;;  %vm228_vm2 = vcmp.eq.s32.totalorder %v58_v42, %v1286_v40 }
  0x8f   :  { %v967_v45 = vsel %vm230_vm1, 1.0, %v1176_v1  ;;  %v965_v46 = vsel %vm228_vm2, 1.0, %v1176_v1 }
  0x90   :  { %v335_v53 = vsel %vm324_vm4, %v967_v45, 0.0  ;;  %v325_v54 = vsel %vm324_vm4, %v965_v46, 0.0 }
  0x91   :  { %v73_v43 = vpop.permute.xlu1 %72  ;;  %v62_v44 = vpop.permute.xlu0 %61 }
  0x92   :  { %vm231_vm5 = vcmp.eq.s32.totalorder %v73_v43, %v1286_v40  ;;  %vm229_vm6 = vcmp.eq.s32.totalorder %v62_v44, %v1286_v40 }
  0x93   :  { %v968_v47 = vsel %vm231_vm5, 1.0, %v1176_v1  ;;  %v966_v48 = vsel %vm229_vm6, 1.0, %v1176_v1 }
  0x94   :  { %v336_v49 = vsel %vm326_vm3, %v968_v47, 0.0  ;;  %v327_v50 = vsel %vm326_vm3, %v966_v48, 0.0 }
  0x95   :  { %v150_v51 = vpop.permute.xlu1 %149  ;;  %v146_v52 = vpop.permute.xlu0 %145  ;;  %v337_v55 = vadd.f32 %v336_v49, %v335_v53  ;;  %v328_v56 = vadd.f32 %v327_v50, %v325_v54 }
  0x96   :  { %vm245_vm7 = vcmp.eq.s32.totalorder %v150_v51, %v1286_v40  ;;  %vm244_vm8 = vcmp.eq.s32.totalorder %v146_v52, %v1286_v40 }
  0x97   :  { %v338_v59 = vrot.slane %v337_v55, 4  ;;  %v329_v60 = vrot.slane %v328_v56, 4  ;;  %v982_v61 = vsel %vm245_vm7, 1.0, %v1176_v1  ;;  %v981_v62 = vsel %vm244_vm8, 1.0, %v1176_v1 }
  0x98   :  { %v399_v2 = vsel %vm326_vm3, %v982_v61, 0.0  ;;  %v398_v3 = vsel %vm324_vm4, %v981_v62, 0.0 }
  0x99   :  { %v161_v57 = vpop.permute.xlu1 %160  ;;  %v157_v58 = vpop.permute.xlu0 %156  ;;  %v339_v6 = vadd.f32 %v338_v59, %v337_v55  ;;  %v330_v7 = vadd.f32 %v329_v60, %v328_v56  ;;  %v400_v10 = vadd.f32 %v399_v2, %v398_v3 }
  0x9a   :  { %vm247_vm9 = vcmp.eq.s32.totalorder %v161_v57, %v1286_v40  ;;  %vm246_vm10 = vcmp.eq.s32.totalorder %v157_v58, %v1286_v40 }
  0x9b   :  { %v984_v4 = vsel %vm247_vm9, 1.0, %v1176_v1  ;;  %v983_v5 = vsel %vm246_vm10, 1.0, %v1176_v1  ;;  %v340_v13 = vrot.slane %v339_v6, 2  ;;  %v331_v14 = vrot.slane %v330_v7, 2 }
  0x9c   :  { %v408_v11 = vsel %vm326_vm3, %v984_v4, 0.0  ;;  %v407_v12 = vsel %vm324_vm4, %v983_v5, 0.0  ;;  %v401_v18 = vrot.slane %v400_v10, 4 }
  0x9d   :  { %v84_v63 = vpop.permute.xlu1 %83  ;;  %v80_v0 = vpop.permute.xlu0 %79  ;;  %v409_v15 = vadd.f32 %v408_v11, %v407_v12  ;;  %v341_v19 = vadd.f32 %v340_v13, %v339_v6  ;;  %v332_v20 = vadd.f32 %v331_v14, %v330_v7 }
  0x9e   :  { %vm233_vm11 = vcmp.eq.s32.totalorder %v84_v63, %v1286_v40  ;;  %vm232_vm12 = vcmp.eq.s32.totalorder %v80_v0, %v1286_v40  ;;  %v402_v26 = vadd.f32 %v401_v18, %v400_v10 }
  0x9f   :  { %v410_v21 = vrot.slane %v409_v15, 4  ;;  %v970_v22 = vsel %vm233_vm11, 1.0, %v1176_v1  ;;  %v969_v23 = vsel %vm232_vm12, 1.0, %v1176_v1  ;;  %v342_v27 = vrot.slane %v341_v19, 1 }
  0xa0   :  { %v333_v28 = vrot.slane %v332_v20, 1  ;;  %v345_v29 = vsel %vm326_vm3, %v970_v22, 0.0  ;;  %v344_v30 = vsel %vm324_vm4, %v969_v23, 0.0  ;;  %v403_v34 = vrot.slane %v402_v26, 2 }
  0xa1   :  { %v172_v8 = vpop.permute.xlu1 %171  ;;  %v168_v9 = vpop.permute.xlu0 %167  ;;  %v411_v31 = vadd.f32 %v410_v21, %v409_v15  ;;  %v346_v35 = vadd.f32 %v345_v29, %v344_v30  ;;  %v343_v37 = vadd.f32 %v342_v27, %v341_v19 }
  0xa2   :  { %vm249_vm13 = vcmp.eq.s32.totalorder %v172_v8, %v1286_v40  ;;  %vm248_vm14 = vcmp.eq.s32.totalorder %v168_v9, %v1286_v40  ;;  %v334_v38 = vadd.f32 %v333_v28, %v332_v20  ;;  %v404_v4 = vadd.f32 %v403_v34, %v402_v26 }
  0xa3   :  { %v986_v39 = vsel %vm249_vm13, 1.0, %v1176_v1  ;;  %v985_v41 = vsel %vm248_vm14, 1.0, %v1176_v1  ;;  %v412_v42 = vrot.slane %v411_v31, 2  ;;  %v347_v51 = vrot.slane %v346_v35, 4 }
  0xa4   :  { %v417_v52 = vsel %vm326_vm3, %v986_v39, 0.0  ;;  %v416_v53 = vsel %vm324_vm4, %v985_v41, 0.0  ;;  %v471_v3 = vpack.c.bf16 %v343_v37, %v343_v37  ;;  %v470_v7 = vpack.c.bf16 %v334_v38, %v334_v38 }
  0xa5   :  { %v95_v16 = vpop.permute.xlu1 %94  ;;  %v91_v17 = vpop.permute.xlu0 %90  ;;  %v418_v5 = vadd.f32 %v417_v52, %v416_v53  ;;  %v413_v8 = vadd.f32 %v412_v42, %v411_v31  ;;  %v348_v11 = vadd.f32 %v347_v51, %v346_v35  ;;  %v405_v20 = vrot.slane %v404_v4, 1 }
  0xa6   :  { %vm235_vm15 = vcmp.eq.s32.totalorder %v95_v16, %v1286_v40  ;;  %vm234_vm1 = vcmp.eq.s32.totalorder %v91_v17, %v1286_v40  ;;  %v1356_v19 = vunpack.c.l.b16 %v471_v3  ;;  %v1360_v27 = vunpack.c.l.b16 %v470_v7 }
  0xa7   :  { %v972_v43 = vsel %vm235_vm15, 1.0, %v1176_v1  ;;  %v971_v44 = vsel %vm234_vm1, 1.0, %v1176_v1  ;;  %v419_v21 = vrot.slane %v418_v5, 4  ;;  %v414_v23 = vrot.slane %v413_v8, 1 }
  0xa8   :  { %v354_v55 = vsel %vm326_vm3, %v972_v43, 0.0  ;;  %v353_v56 = vsel %vm324_vm4, %v971_v44, 0.0  ;;  %v349_v28 = vrot.slane %v348_v11, 2  ;;  %v1365_v42 = vadd.f32 %v405_v20, %v404_v4 }
  0xa9   :  { %v183_v24 = vpop.permute.xlu1 %182  ;;  %v179_v25 = vpop.permute.xlu0 %178  ;;  %v355_v6 = vadd.f32 %v354_v55, %v353_v56  ;;  %v420_v37 = vadd.f32 %v419_v21, %v418_v5  ;;  %v1367_v43 = vadd.f32 %v414_v23, %v413_v8 }
  0xaa   :  { %vm251_vm2 = vcmp.eq.s32.totalorder %v183_v24, %v1286_v40  ;;  %vm250_vm5 = vcmp.eq.s32.totalorder %v179_v25, %v1286_v40 }
  0xab   :  { %v988_v45 = vsel %vm251_vm2, 1.0, %v1176_v1  ;;  %v987_v48 = vsel %vm250_vm5, 1.0, %v1176_v1  ;;  %v356_v22 = vrot.slane %v355_v6, 4 }
  0xac   :  { %v426_v57 = vsel %vm326_vm3, %v988_v45, 0.0  ;;  %v425_v58 = vsel %vm324_vm4, %v987_v48, 0.0  ;;  %v1371_v45 = vadd.f32 %v349_v28, %v348_v11 }
  0xad   :  { %v106_v32 = vpop.permute.xlu1 %105  ;;  %v102_v33 = vpop.permute.xlu0 %101  ;;  %v427_v12 = vadd.f32 %v426_v57, %v425_v58  ;;  %v357_v38 = vadd.f32 %v356_v22, %v355_v6 }
  0xae   :  { %vm237_vm6 = vcmp.eq.s32.totalorder %v106_v32, %v1286_v40  ;;  %vm236_vm7 = vcmp.eq.s32.totalorder %v102_v33, %v1286_v40 }
  0xaf   :  { %v974_v49 = vsel %vm237_vm6, 1.0, %v1176_v1  ;;  %v973_v50 = vsel %vm236_vm7, 1.0, %v1176_v1  ;;  %v428_v29 = vrot.slane %v427_v12, 4  ;;  %v358_v55 = vrot.slane %v357_v38, 2 }
  0xb0   :  { %v363_v59 = vsel %vm326_vm3, %v974_v49, 0.0  ;;  %v362_v60 = vsel %vm324_vm4, %v973_v50, 0.0 }
  0xb1   :  { %v194_v46 = vpop.permute.xlu1 %193  ;;  %v190_v47 = vpop.permute.xlu0 %189  ;;  %v364_v13 = vadd.f32 %v363_v59, %v362_v60  ;;  %v359_v11 = vadd.f32 %v358_v55, %v357_v38 }
  0xb2   :  { %vm253_vm8 = vcmp.eq.s32.totalorder %v194_v46, %v1286_v40  ;;  %vm252_vm9 = vcmp.eq.s32.totalorder %v190_v47, %v1286_v40  ;;  %v429_v46 = vadd.f32 %v428_v29, %v427_v12 }
  0xb3   :  { %v990_v54 = vsel %vm253_vm8, 1.0, %v1176_v1  ;;  %v989_v61 = vsel %vm252_vm9, 1.0, %v1176_v1  ;;  %v365_v30 = vrot.slane %v364_v13, 4  ;;  %vm526_vm9 = vcmask 1041409  }
  0xb4   :  { %v435_v0 = vsel %vm326_vm3, %v990_v54, 0.0  ;;  %v434_v2 = vsel %vm324_vm4, %v989_v61, 0.0  ;;  %v421_v54 = vrot.slane %v420_v37, 2  ;;  %v351_v61 = vrot.slane %v1371_v45, 1 }
  0xb5   :  { %v117_v62 = vpop.permute.xlu1 %116  ;;  %v113_v63 = vpop.permute.xlu0 %112  ;;  %v436_v14 = vadd.f32 %v435_v0, %v434_v2  ;;  %v366_v47 = vadd.f32 %v365_v30, %v364_v13 }
  0xb6   :  { %vm239_vm10 = vcmp.eq.s32.totalorder %v117_v62, %v1286_v40  ;;  %vm238_vm11 = vcmp.eq.s32.totalorder %v113_v63, %v1286_v40  ;;  %v430_v62 = vrot.slane %v429_v46, 2  ;;  %v422_v7 = vadd.f32 %v421_v54, %v420_v37 }
  0xb7   :  { %v976_v9 = vsel %vm239_vm10, 1.0, %v1176_v1  ;;  %v975_v10 = vsel %vm238_vm11, 1.0, %v1176_v1  ;;  %v437_v33 = vrot.slane %v436_v14, 4  ;;  %v367_v63 = vrot.slane %v366_v47, 2 }
  0xb8   :  { %v372_v17 = vsel %vm326_vm3, %v976_v9, 0.0  ;;  %v371_v18 = vsel %vm324_vm4, %v975_v10, 0.0  ;;  %v423_v28 = vrot.slane %v422_v7, 1  ;;  %vm528_vm10 = vcmask 1042434  }
  0xb9   :  { %v205_v15 = vpop.permute.xlu1 %204  ;;  %v201_v16 = vpop.permute.xlu0 %200  ;;  %v373_v24 = vadd.f32 %v372_v17, %v371_v18  ;;  %v438_v51 = vadd.f32 %v437_v33, %v436_v14  ;;  %vm532_vm11 = vcmask 1044484  }
  0xba   :  { %vm255_vm12 = vcmp.eq.s32.totalorder %v205_v15, %v1286_v40  ;;  %vm254_vm13 = vcmp.eq.s32.totalorder %v201_v16, %v1286_v40  ;;  %v431_v15 = vadd.f32 %v430_v62, %v429_v46  ;;  %v368_v16 = vadd.f32 %v367_v63, %v366_v47 }
  0xbb   :  { %v992_v25 = vsel %vm255_vm12, 1.0, %v1176_v1  ;;  %v991_v26 = vsel %vm254_vm13, 1.0, %v1176_v1  ;;  %v374_v39 = vrot.slane %v373_v24, 4  ;;  %v439_v4 = vrot.slane %v438_v51, 2 }
  0xbc   :  { %v444_v34 = vsel %vm326_vm3, %v992_v25, 0.0  ;;  %v443_v35 = vsel %vm324_vm4, %v991_v26, 0.0  ;;  %v432_v37 = vrot.slane %v431_v15, 1  ;;  %v479_v62 = vpack.c.bf16 %v1367_v43, %v1367_v43 }
  0xbd   :  { %v128_v31 = vpop.permute.xlu1 %127  ;;  %v124_v32 = vpop.permute.xlu0 %123  ;;  %v445_v41 = vadd.f32 %v444_v34, %v443_v35  ;;  %v375_v56 = vadd.f32 %v374_v39, %v373_v24  ;;  %v440_v21 = vadd.f32 %v439_v4, %v438_v51  ;;  %vm534_vm12 = vcmask 1045509  }
  0xbe   :  { %vm241_vm14 = vcmp.eq.s32.totalorder %v128_v31, %v1286_v40  ;;  %vm240_vm15 = vcmp.eq.s32.totalorder %v124_v32, %v1286_v40  ;;  %v360_v32 = vrot.slane %v359_v11, 1  ;;  %vm536_vm13 = vcmask 1046534  }
  0xbf   :  { %v978_v44 = vsel %vm241_vm14, 1.0, %v1176_v1  ;;  %v446_v48 = vrot.slane %v445_v41, 4  ;;  %v977_v53 = vsel %vm240_vm15, 1.0, %v1176_v1  ;;  %v376_v8 = vrot.slane %v375_v56, 2 }
  0xc0   :  { %v381_v52 = vsel %vm326_vm3, %v978_v44, 0.0  ;;  %v380_v57 = vsel %vm324_vm4, %v977_v53, 0.0  ;;  %v369_v44 = vrot.slane %v368_v16, 1  ;;  %v441_v46 = vrot.slane %v440_v21, 1 }
  0xc1   :  { %v216_v49 = vpop.permute.xlu1 %215  ;;  %v212_v50 = vpop.permute.xlu0 %211  ;;  %v447_v58 = vadd.f32 %v446_v48, %v445_v41  ;;  %v382_v59 = vadd.f32 %v381_v52, %v380_v57  ;;  %v377_v25 = vadd.f32 %v376_v8, %v375_v56  ;;  %v352_v52 = vadd.f32 %v351_v61, %v1371_v45 }
  0xc2   :  { %vm257_vm1 = vcmp.eq.s32.totalorder %v216_v49, %v1286_v40  ;;  %vm256_vm2 = vcmp.eq.s32.totalorder %v212_v50, %v1286_v40  ;;  %v424_v53 = vadd.f32 %v423_v28, %v422_v7  ;;  %v361_v54 = vadd.f32 %v360_v32, %v359_v11 }
  0xc3   :  { %v994_v60 = vsel %vm257_vm1, 1.0, %v1176_v1  ;;  %v383_v5 = vrot.slane %v382_v59, 4  ;;  %v993_v6 = vsel %vm256_vm2, 1.0, %v1176_v1  ;;  %v448_v12 = vrot.slane %v447_v58, 2 }
  0xc4   :  { %v453_v0 = vsel %vm326_vm3, %v994_v60, 0.0  ;;  %v452_v9 = vsel %vm324_vm4, %v993_v6, 0.0  ;;  %v378_v47 = vrot.slane %v377_v25, 1  ;;  %v433_v56 = vadd.f32 %v432_v37, %v431_v15 }
  0xc5   :  { %v139_v2 = vpop.permute.xlu1 %138  ;;  %v135_v3 = vpop.permute.xlu0 %134  ;;  %v384_v13 = vadd.f32 %v383_v5, %v382_v59  ;;  %v454_v14 = vadd.f32 %v453_v0, %v452_v9  ;;  %v449_v29 = vadd.f32 %v448_v12, %v447_v58  ;;  %v478_v60 = vpack.c.bf16 %v1365_v42, %v1365_v42 }
  0xc6   :  { %vm243_vm5 = vcmp.eq.s32.totalorder %v139_v2, %v1286_v40  ;;  %vm242_vm6 = vcmp.eq.s32.totalorder %v135_v3, %v1286_v40  ;;  %v370_v63 = vadd.f32 %v369_v44, %v368_v16  ;;  %v442_v0 = vadd.f32 %v441_v46, %v440_v21 }
  0xc7   :  { %v980_v10 = vsel %vm243_vm5, 1.0, %v1176_v1  ;;  %v385_v22 = vrot.slane %v384_v13, 2  ;;  %v455_v23 = vrot.slane %v454_v14, 4  ;;  %v979_v24 = vsel %vm242_vm6, 1.0, %v1176_v1 }
  0xc8   :  { %v390_v17 = vsel %vm326_vm3, %v980_v10, 0.0  ;;  %v389_v26 = vsel %vm324_vm4, %v979_v24, 0.0  ;;  %v450_v48 = vrot.slane %v449_v29, 1  ;;  %v379_v2 = vadd.f32 %v378_v47, %v377_v25 }
  0xc9   :  { %v227_v18 = vpop.permute.xlu1 %226  ;;  %v223_v20 = vpop.permute.xlu0 %222  ;;  %v456_v30 = vadd.f32 %v455_v23, %v454_v14  ;;  %v391_v31 = vadd.f32 %v390_v17, %v389_v26  ;;  %v386_v33 = vadd.f32 %v385_v22, %v384_v13  ;;  %v472_v4 = vpack.c.bf16 %v352_v52, %v352_v52 }
  0xca   :  { %vm259_vm7 = vcmp.eq.s32.totalorder %v227_v18, %v1286_v40  ;;  %vm258_vm8 = vcmp.eq.s32.totalorder %v223_v20, %v1286_v40  ;;  %v451_v45 = vadd.f32 %v450_v48, %v449_v29  ;;  %v480_v5 = vpack.c.bf16 %v424_v53, %v424_v53 }
  0xcb   :  { %v996_v34 = vsel %vm259_vm7, 1.0, %v1176_v1  ;;  %v995_v35 = vsel %vm258_vm8, 1.0, %v1176_v1  ;;  %v457_v38 = vrot.slane %v456_v30, 2  ;;  %v392_v39 = vrot.slane %v391_v31, 4 }
  0xcc   :  { %v462_v41 = vsel %vm326_vm3, %v996_v34, 0.0  ;;  %v461_v40 = vsel %vm324_vm4, %v995_v35, 0.0  ;;  %v387_v55 = vrot.slane %v386_v33, 1  ;;  %vm530_vm3 = vcmask 1043459  }
  0xcd   :  { %v458_v49 = vadd.f32 %v457_v38, %v456_v30  ;;  %v393_v50 = vadd.f32 %v392_v39, %v391_v31  ;;  %v463_v51 = vadd.f32 %v462_v41, %v461_v40  ;;  %v473_v8 = vpack.c.bf16 %v361_v54, %v361_v54 }
  0xce   :  { %v388_v6 = vadd.f32 %v387_v55, %v386_v33  ;;  %v481_v9 = vpack.c.bf16 %v433_v56, %v433_v56  ;;  %v518_v11 = vunpack.c.l.b16 %v478_v60  ;;  %v519_v12 = vunpack.c.l.b16 %v479_v62  ;;  %v616_v55 = vld [vmem:[%s1476_s2] sm:$0xff]  ;;  %v617_v56 = vld [vmem:[%s1476_s2 + $0x8] sm:$0xff]  ;;  %v618_v60 = vld [vmem:[%s1476_s2 + $0x10] sm:$0xff] }
  0xcf   :  { %v459_v57 = vrot.slane %v458_v49, 1  ;;  %v394_v58 = vrot.slane %v393_v50, 2  ;;  %v464_v59 = vrot.slane %v463_v51, 4  ;;  %v474_v43 = vpack.c.bf16 %v370_v63, %v370_v63  ;;  %v619_v62 = vld [vmem:[%s1476_s2 + $0x18] sm:$0xff] }
  0xd0   :  { %v482_v13 = vpack.c.bf16 %v442_v0, %v442_v0  ;;  %v475_v14 = vpack.c.bf16 %v379_v2, %v379_v2  ;;  %v483_v15 = vpack.c.bf16 %v451_v45, %v451_v45  ;;  %v512_v18 = vunpack.c.l.b16 %v472_v4  ;;  %v780_v45 = vld [vmem:[#allocation2] sm:$0xff]  ;;  %v782_v4 = vld [vmem:[#allocation2 + $0x10] sm:$0xff] }
  0xd1   :  { %v395_v61 = vadd.f32 %v394_v58, %v393_v50  ;;  %v465_v3 = vadd.f32 %v464_v59, %v463_v51  ;;  %v460_v7 = vadd.f32 %v459_v57, %v458_v49  ;;  %v520_v20 = vunpack.c.l.b16 %v480_v5  ;;  %v783_v5 = vld [vmem:[#allocation2 + $0x18] sm:$0xff] }
  0xd2   :  { %v476_v21 = vpack.c.bf16 %v388_v6, %v388_v6  ;;  %v513_v23 = vunpack.c.l.b16 %v473_v8  ;;  %v521_v24 = vunpack.c.l.b16 %v481_v9  ;;  %v527_v28 = vsel %vm526_vm9, %v1356_v19, %v1360_v27  ;;  %v866_v8 = vld [vmem:[%s1481_s7 + $0x8] sm:$0xff] }
  0xd3   :  { %v396_v10 = vrot.slane %v395_v61, 1  ;;  %v466_v42 = vrot.slane %v465_v3, 2  ;;  %v484_v22 = vpack.c.bf16 %v460_v7, %v460_v7  ;;  %v514_v29 = vunpack.c.l.b16 %v474_v43  ;;  %v865_v7 = vld [vmem:[%s1481_s7] sm:$0xff] }
  0xd4   :  { %v522_v30 = vunpack.c.l.b16 %v482_v13  ;;  %v540_v31 = vsel %vm526_vm9, %v519_v12, %v518_v11  ;;  %v515_v32 = vunpack.c.l.b16 %v475_v14  ;;  %v523_v33 = vunpack.c.l.b16 %v483_v15  ;;  %v1004_v11 = vld [vmem:[%s1478_s4] ss:$0 sm:$0xff]  ;;  %v867_v15 = vld [vmem:[%s1481_s7 + $0x10] sm:$0xff] }
  0xd5   :  { %v397_v16 = vadd.f32 %v396_v10, %v395_v61  ;;  %v467_v17 = vadd.f32 %v466_v42, %v465_v3  ;;  %v529_v35 = vsel %vm528_vm10, %v512_v18, %v527_v28  ;;  %v541_v37 = vsel %vm528_vm10, %v520_v20, %v540_v31  ;;  %v781_v61 = vld [vmem:[#allocation2 + $0x8] sm:$0xff] }
  0xd6   :  { %v516_v38 = vunpack.c.l.b16 %v476_v21  ;;  %v524_v39 = vunpack.c.l.b16 %v484_v22  ;;  %v531_v41 = vsel %vm530_vm3, %v513_v23, %v529_v35  ;;  %v542_v44 = vsel %vm530_vm3, %v521_v24, %v541_v37  ;;  %v1007_v23 = vld [vmem:[%s1482_s8] ss:$0 sm:$0xff] }
  0xd7   :  { %v477_v25 = vpack.c.bf16 %v397_v16, %v397_v16  ;;  %v468_v26 = vrot.slane %v467_v17, 1  ;;  %v533_v27 = vsel %vm532_vm11, %v514_v29, %v531_v41  ;;  %v543_v47 = vsel %vm532_vm11, %v522_v30, %v542_v44 }
  0xd8   :  { %vm538_vm14 = vcmask 1047559   ;;  %v535_v48 = vsel %vm534_vm12, %v515_v32, %v533_v27  ;;  %v544_v49 = vsel %vm534_vm12, %v523_v33, %v543_v47  ;;  %vm624_vm15 = vcmask 261120  }
  0xd9   :  { %v469_v34 = vadd.f32 %v468_v26, %v467_v17  ;;  %v517_v46 = vunpack.c.l.b16 %v477_v25  ;;  %v537_v50 = vsel %vm536_vm13, %v516_v38, %v535_v48  ;;  %v545_v51 = vsel %vm536_vm13, %v524_v39, %v544_v49  ;;  %v1005_v17 = vld [vmem:[%s1480_s6] ss:$0 sm:$0xff] }
  0xda   :  { %v1097_v58 = vpack.c.bf16 %v617_v56, %v616_v55  ;;  %v1100_v2 = vpack.c.bf16 %v619_v62, %v618_v60  ;;  %v1103_v3 = vpack.c.bf16 %v781_v61, %v780_v45  ;;  %v1106_v6 = vpack.c.bf16 %v783_v5, %v782_v4 }
  0xdb   :  { %v485_v19 = vpack.c.bf16 %v469_v34, %v469_v34  ;;  %v539_v52 = vsel %vm538_vm14, %v517_v46, %v537_v50  ;;  %v1109_v9 = vpack.c.bf16 %v866_v8, %v865_v7 }
  0xdd   :  { %v525_v40 = vunpack.c.l.b16 %v485_v19 }
  0xdf   :  { %v546_v53 = vsel %vm538_vm14, %v525_v40, %v545_v51 }
  0xe0   :  { %v547_v54 = vpack.c.b16 %v546_v53, %v539_v52 }
  0xe2   :  { %1043 = vmatmul.mubr.msk.bf16.vlgmr.msra.gmra.mrb[0].mxu0 %vm324_vm4, %v547_v54 }
  0xe3   :  { %1076 = vmatprep.mubr.msk.f32.mxu0 %vm1177_vm0, %v1176_v1  ;;  %1104 = vmatpush3.bf16.msra.mxu0 %v1103_v3 }
  0xe4   :  { %1105 = vmatprep.subr.bf16.mxu0 %v1178_v36 }
  0xe7   :  { %1107 = vmatpush3.bf16.msra.mxu0 %v1106_v6 }
 0x1b5   :  { %v609_v57 = vpop.f32.mrb[0].mxu0 }
 0x1b6   :  { %v1044_v59 = vpop.f32.mrb[1].mxu0 }
 0x1b7   :  { %v612_v63 = vpop.f32.mrb[2].mxu0 }
 0x1b8   :  { %v1045_v0 = vpop.f32.mrb[3].mxu0  ;;  %1055 = vmatmul.mubr.msk.f32.vlgmr.msra.gmra.mrb[0].mxu1 %vm624_vm15, %v612_v63 }
 0x1b9   :  { %1098 = vmatpush3.bf16.msra.mxu1 %v1097_v58  ;;  %1065 = vmatprep.mubr.msk.f32.mxu1 %vm1177_vm0, %v1176_v1 }
 0x1ba   :  { %1099 = vmatprep.subr.bf16.mxu1 %v1178_v36 }
 0x1bd   :  { %1101 = vmatpush3.bf16.msra.mxu1 %v1100_v2 }
 0x1be   :  { %1108 = vmatprep.subr.bf16.mxu1 %v1178_v36 }
 0x1c0   :  { %1066 = vmatmul.mubr.msk.f32.vlgmr.msra.gmra.mrb[2].mxu1 %vm624_vm15, %v609_v57 }
 0x1c1   :  { %1087 = vmatprep.mubr.msk.f32.mxu1 %vm1177_vm0, %v1176_v1  ;;  %1110 = vmatpush3.bf16.msra.mxu1 %v1109_v9 }
 0x1c2   :  { %1111 = vmatprep.subr.bf16.mxu1 %v1178_v36  ;;  %v868_v36 = vld [vmem:[%s1481_s7 + $0x18] sm:$0xff]  ;;  %s1147_s7 = scalar_lea.vmem %s957_s16, 128 }
 0x1c3   :  { %v1112_v16 = vpack.c.bf16 %v868_v36, %v867_v15  ;;  %p1148_p8 = scmp.ne.s32.totalorder %s957_s16, %s1147_s7  ;;  %p1153_p10 = scmp.lt.s32.totalorder %s1147_s7, %s1147_s7 }
 0x1c5   :  { %1113 = vmatpush3.bf16.msra.mxu1 %v1112_v16  ;;  %p1154_p11 = por %p1153_p10, %p1152_p9 }
 0x1c7   :  { %p1155_p12 = pnand %p1154_p11, %p1148_p8 }
 0x28b   :  { %v694_v1 = vpop.f32.mrb[0].mxu1 }
 0x28c   :  { %v1056_v10 = vpop.f32.mrb[1].mxu1 }
 0x293   :  { %v767_v42 = vpop.f32.mrb[2].mxu1 }
 0x294   :  { %v768_v12 = vadd.f32 %v767_v42, %v694_v1  ;;  %v1067_v43 = vpop.f32.mrb[3].mxu1 }
 0x296   :  { %v778_v13 = vadd.f32 %v1004_v11, %v768_v12 }
 0x298   :  { %v779_v14 = vmax.f32 %v778_v13, 0.0 }
 0x29a   :  { %1077 = vmatmul.mubr.msk.f32.vlgmr.msra.gmra.mrb[4].mxu0 %vm624_vm15, %v779_v14 }
 0x36d   :  { %v860_v18 = vpop.f32.mrb[4].mxu0 }
 0x36e   :  { %v861_v20 = vadd.f32 %v1005_v17, %v860_v18  ;;  %v1078_v21 = vpop.f32.mrb[5].mxu0 }
 0x370   :  { %v864_v22 = vmax.f32 %v861_v20, 0.0 }
 0x372   :  { %1088 = vmatmul.mubr.msk.f32.vlgmr.msra.gmra.mrb[4].mxu1 %vm624_vm15, %v864_v22 }
 0x445   :  { %v945_v24 = vpop.f32.mrb[4].mxu1 }
 0x446   :  { %v946_v25 = vadd.f32 %v1007_v23, %v945_v24  ;;  %v1089_v26 = vpop.f32.mrb[5].mxu1 }
 0x448   :  { %949 = vst [vmem:[#allocation5] sm:$0xff] %v946_v25 }
 0x449   :  { %1158 = shalt.err (!%p1155_p12)
}
 0x44a   :  { %s1159_s1 = scalar_lea.hbm %s1483_s9, 128 }
 0x44b   :  { %p1160_p13 = scmp.ne.s32.totalorder %s1483_s9, %s1159_s1  ;;  %p1163_p0 = scmp.lt.u32.totalorder %s1159_s1, %s1483_s9 }
 0x44d   :  { %p1165_p1 = pnand %p1163_p0, %p1160_p13 }
 0x44f   :  { %1168 = shalt.err (!%p1165_p1)
}
 0x450   :  { %959 = dma.vmem_to_hbm [thread:$0]  %s957_s16, 128, %s1483_s9, [#allocation4]  }
 0x451   :  { %1171 = dma.done.wait [#allocation4], 128  }
 0x452   :  { %1172 = vsyncadd [#allocation4], 4294967168 }
 0x453   :  { %963 = vsyncpa [#allocation3], 1 }
 0x454   :  { %964 = vsyncpa [#allocation4], 1 }

</bundles_post_ra>
